<compile_context>
chip_gen: v5e
topology: v5e:2x2
jax: 0.10.0
libtpu: 0.0.40
codegen_flags: <defaults>
</compile_context>

<pallas_src>
import functools

import jax
import jax.numpy as jnp
from jax import lax
from jax.experimental import pallas as pl
from jax.experimental.pallas import tpu as pltpu


def _loss_kernel(x_ref, y_ref,
                 inter_out, pred_out, gt_out, bce_out,
                 inter_acc, pred_acc, gt_acc, bce_acc,
                 *, tile, chunk, tiles_per_part, hw_valid, needs_mask):
    """Grid = (parallel spatial parts, reduction over spatial tiles)."""
    k = pl.program_id(1)

    @pl.when(k == 0)
    def _():
        inter_acc[...] = jnp.zeros_like(inter_acc)
        pred_acc[...] = jnp.zeros_like(pred_acc)
        gt_acc[...] = jnp.zeros_like(gt_acc)
        bce_acc[...] = jnp.zeros_like(bce_acc)

    rows = x_ref.shape[0]
    n_chunks = tile // chunk
    # Unclamped global lane offset of this tile: clamped (duplicate) boundary
    # steps get base >= hw_valid and are therefore fully masked out.
    base = (pl.program_id(0) * tiles_per_part + k) * tile

    if needs_mask:
        # Hoisted, loop-invariant lane iota.
        lane = lax.broadcasted_iota(jnp.int32, (rows, chunk), 1)

    def body(c, carry):
        inter_r, pred_r, gt_r, bce_r = carry
        off = pl.multiple_of(c * chunk, chunk)
        x = x_ref[:, pl.ds(off, chunk)].astype(jnp.float32)
        y = y_ref[:, pl.ds(off, chunk)].astype(jnp.float32)

        if needs_mask:
            m = ((lane + (base + c * chunk)) < hw_valid).astype(jnp.float32)
            # Zero the raw inputs first so OOB garbage / NaN from boundary
            # blocks can never poison exp / the accumulators.
            x = x * m
            y = y * m

        # Share one transcendental: e = exp(-|x|) feeds both sigmoid and softplus.
        e = jnp.exp(-jnp.abs(x))
        d = 1.0 + e
        r = pl.reciprocal(d, approx=True)
        r = r * (2.0 - d * r)                       # one Newton step -> f32 accurate
        p = jnp.where(x >= 0.0, 1.0, e) * r         # sigmoid(x)
        # Numerically stable BCE-with-logits (matches torch.nn.BCEWithLogitsLoss):
        #   max(x, 0) - x*y + log(1 + exp(-|x|))
        bce = jnp.maximum(x, 0.0) - x * y + jnp.log1p(e)

        if needs_mask:
            # x=y=0 on padded lanes still gives p=0.5, bce=ln2 -> mask them out.
            p = p * m
            bce = bce * m

        return (inter_r + p * y, pred_r + p, gt_r + y, bce_r + bce)

    zeros = jnp.zeros((rows, chunk), jnp.float32)
    unroll = True if n_chunks <= 8 else 4
    inter_r, pred_r, gt_r, bce_r = lax.fori_loop(
        0, n_chunks, body, (zeros, zeros, zeros, zeros), unroll=unroll)

    # Exactly one VMEM read-modify-write per statistic per grid step.
    inter_acc[...] += inter_r
    pred_acc[...] += pred_r
    gt_acc[...] += gt_r
    bce_acc[...] += bce_r

    @pl.when(k == pl.num_programs(1) - 1)
    def _():
        # Single cross-lane reduce per statistic, once per parallel part.
        inter_out[0, :, :] = jnp.sum(inter_acc[...], axis=1, keepdims=True)
        pred_out[0, :, :] = jnp.sum(pred_acc[...], axis=1, keepdims=True)
        gt_out[0, :, :] = jnp.sum(gt_acc[...], axis=1, keepdims=True)
        bce_out[0, :, :] = jnp.sum(bce_acc[...], axis=1, keepdims=True)


def _device_kind():
    try:
        return jax.devices()[0].device_kind.lower()
    except Exception:
        return ""


def dc_and_bce_loss(net_output, target, *, smooth=1.0,
                    weight_ce=1.0, weight_dice=1.0,
                    num_parallel=None, max_tile_lanes=None):
    """net_output/target: (B, C, *spatial); target is one-hot regions.

    Inputs stream in their native dtype (bf16 logits / int8 targets supported);
    all arithmetic is f32 inside the kernel.
    """
    shape = net_output.shape
    B, C = int(shape[0]), int(shape[1])
    HW = 1
    for s in shape[2:]:
        HW *= int(s)
    BC = B * C

    # No dtype up-cast and no padding copy in the wrapper: reshape only.
    x2 = net_output.reshape(BC, HW)
    y2 = target.reshape(BC, HW)
    xb = x2.dtype.itemsize
    yb = y2.dtype.itemsize

    kind = _device_kind()
    is_v7 = "v7" in kind
    if num_parallel is None:
        num_parallel = 2 if is_v7 else 1     # only v7x has 2 TensorCores

    # Register-blocked inner chunk width: keep (4 accumulators + ~5 transients)
    # per row-group comfortably inside the 64-entry vreg file.
    row_groups = pl.cdiv(BC, 8)
    chunk = 128 * max(1, min(4, 40 // (9 * row_groups)))

    # Multi-MiB double-buffered input blocks (smaller budget on v7x: 64 MiB VMEM/TC).
    in_budget = (8 << 20) if is_v7 else (24 << 20)
    bytes_per_lane = 2 * BC * (xb + yb)               # 2 buffers x (x + y)
    tile_vmem = max(128, (in_budget // bytes_per_lane) // 128 * 128)

    P = max(1, int(num_parallel))
    tile_needed = pl.cdiv(pl.cdiv(HW, P), 128) * 128  # don't exceed each part's share
    tile = max(128, min(tile_vmem, tile_needed))
    if max_tile_lanes is not None:                    # test / tuning hook
        tile = max(128, min(tile, pl.cdiv(int(max_tile_lanes), 128) * 128))
    chunk = min(chunk, tile)
    tile = max(chunk, (tile // chunk) * chunk)        # tile % chunk == 0
    assert tile % chunk == 0 and tile % 128 == 0

    num_blocks = pl.cdiv(HW, tile)
    P = max(1, min(P, num_blocks))
    tiles_per_part = pl.cdiv(num_blocks, P)
    needs_mask = (P * tiles_per_part * tile) != HW

    kernel = functools.partial(
        _loss_kernel,
        tile=tile, chunk=chunk,
        tiles_per_part=tiles_per_part,
        hw_valid=HW, needs_mask=needs_mask)

    def in_index(p, k, _tpp=tiles_per_part, _nb=num_blocks):
        # Clamp so a ragged parallel split never requests a fully OOB block;
        # the duplicate read is zeroed by the in-kernel mask.
        return (0, jnp.minimum(p * _tpp + k, _nb - 1))

    part_shape = jax.ShapeDtypeStruct((P, BC, 1), jnp.float32)
    in_specs = [pl.BlockSpec((BC, tile), in_index) for _ in range(2)]
    out_specs = [pl.BlockSpec((1, BC, 1), lambda p, k: (p, 0, 0)) for _ in range(4)]

    footprint = 2 * BC * tile * (xb + yb) + 4 * BC * chunk * 4 + (1 << 20)
    cap = (48 << 20) if is_v7 else (64 << 20)
    vmem_limit = int(min(cap, max(32 << 20, footprint + (8 << 20))))

    cost = pl.CostEstimate(
        flops=20 * BC * HW,
        transcendentals=3 * BC * HW,
        bytes_accessed=BC * HW * (xb + yb) + 4 * P * BC * 4,
    )

    inter_p, pred_p, gt_p, bce_p = pl.pallas_call(
        kernel,
        out_shape=(part_shape, part_shape, part_shape, part_shape),
        grid_spec=pltpu.PrefetchScalarGridSpec(
            num_scalar_prefetch=0,
            grid=(P, tiles_per_part),
            in_specs=in_specs,
            out_specs=out_specs,
            scratch_shapes=[pltpu.VMEM((BC, chunk), jnp.float32)
                            for _ in range(4)],
        ),
        compiler_params=pltpu.CompilerParams(
            dimension_semantics=("parallel", "arbitrary"),
            vmem_limit_bytes=vmem_limit,
        ),
        cost_estimate=cost,
    )(x2, y2)

    # Trivial final combine in plain JAX (a few hundred bytes of data).
    intersect = jnp.sum(inter_p, axis=0)[:, 0]   # (BC,)
    sum_pred = jnp.sum(pred_p, axis=0)[:, 0]
    sum_gt = jnp.sum(gt_p, axis=0)[:, 0]
    bce_sum = jnp.sum(bce_p)

    ce_loss = bce_sum / jnp.float32(BC * HW)                    # mean reduction
    dc = (2.0 * intersect + smooth) / jnp.maximum(sum_gt + sum_pred + smooth, 1e-8)
    dc_loss = -jnp.mean(dc)
    return weight_ce * ce_loss + weight_dice * dc_loss


def _reference_loss(net_output, target, smooth=1.0, weight_ce=1.0, weight_dice=1.0):
    """Pure-JAX reference mirroring the PyTorch module (use_ignore_label=False)."""
    x = net_output.astype(jnp.float32)
    y = target.astype(jnp.float32)
    bce = jnp.maximum(x, 0.0) - x * y + jnp.log1p(jnp.exp(-jnp.abs(x)))
    ce_loss = jnp.mean(bce)
    p = jax.nn.sigmoid(x)
    axes = tuple(range(2, x.ndim))
    intersect = jnp.sum(p * y, axis=axes)
    sum_pred = jnp.sum(p, axis=axes)
    sum_gt = jnp.sum(y, axis=axes)
    dc = (2.0 * intersect + smooth) / jnp.maximum(sum_gt + sum_pred + smooth, 1e-8)
    dc_loss = -jnp.mean(dc)
    return weight_ce * ce_loss + weight_dice * dc_loss


if __name__ == "__main__":
    key = jax.random.PRNGKey(0)
    ks = jax.random.split(key, 10)

    # --- Test 1: f32 logits / f32 one-hot target, aligned spatial size ---
    B, C, H, W = 2, 4, 16, 16
    net_output = jax.random.normal(ks[0], (B, C, H, W), dtype=jnp.float32)
    target = (jax.random.uniform(ks[1], (B, C, H, W)) > 0.5).astype(jnp.float32)
    loss = jax.block_until_ready(dc_and_bce_loss(net_output, target))
    ref = _reference_loss(net_output, target)
    assert jnp.allclose(loss, ref, atol=1e-5, rtol=1e-5), (loss, ref)

    # --- Test 2: spatial size NOT a multiple of 128 (boundary block + mask) ---
    B2, C2, H2, W2 = 2, 3, 18, 18
    net_output2 = jax.random.normal(ks[2], (B2, C2, H2, W2), dtype=jnp.float32)
    target2 = (jax.random.uniform(ks[3], (B2, C2, H2, W2)) > 0.5).astype(jnp.float32)
    loss2 = jax.block_until_ready(dc_and_bce_loss(net_output2, target2))
    ref2 = _reference_loss(net_output2, target2)
    assert jnp.allclose(loss2, ref2, atol=1e-5, rtol=1e-5), (loss2, ref2)

    # --- Test 3: native low-precision streaming (bf16 logits, int8 target) ---
    net_bf16 = net_output.astype(jnp.bfloat16)
    tgt_i8 = target.astype(jnp.int8)
    loss3 = jax.block_until_ready(dc_and_bce_loss(net_bf16, tgt_i8))
    ref3 = _reference_loss(net_bf16.astype(jnp.float32), tgt_i8.astype(jnp.float32))
    assert jnp.allclose(loss3, ref3, atol=1e-4, rtol=1e-4), (loss3, ref3)

    # --- Test 4: multi-tile reduction + parallel split + ragged boundary ---
    B4, C4, H4, W4 = 2, 3, 20, 20
    net_output4 = jax.random.normal(ks[4], (B4, C4, H4, W4), dtype=jnp.float32)
    target4 = (jax.random.uniform(ks[5], (B4, C4, H4, W4)) > 0.5).astype(jnp.float32)
    loss4 = jax.block_until_ready(
        dc_and_bce_loss(net_output4, target4, num_parallel=2, max_tile_lanes=128))
    ref4 = _reference_loss(net_output4, target4)
    assert jnp.allclose(loss4, ref4, atol=1e-5, rtol=1e-5), (loss4, ref4)

    # --- Test 5: parallel split with an odd block count (clamped OOB step) ---
    B5, C5, H5, W5 = 1, 2, 19, 19
    net_output5 = jax.random.normal(ks[6], (B5, C5, H5, W5), dtype=jnp.float32)
    target5 = (jax.random.uniform(ks[7], (B5, C5, H5, W5)) > 0.5).astype(jnp.float32)
    loss5 = jax.block_until_ready(
        dc_and_bce_loss(net_output5, target5, num_parallel=2, max_tile_lanes=128))
    ref5 = _reference_loss(net_output5, target5)
    assert jnp.allclose(loss5, ref5, atol=1e-5, rtol=1e-5), (loss5, ref5)

    print("KERNEL_OK")
</pallas_src>

<mosaic_0001>
module attributes {stable_mosaic.version = 11 : i64} {
  func.func @_loss_kernel(%arg0: i32, %arg1: i32, %arg2: memref<8x256xf32, #tpu.memory_space<vmem>>, %arg3: memref<8x256xf32, #tpu.memory_space<vmem>>, %arg4: memref<1x8x1xf32, #tpu.memory_space<vmem>>, %arg5: memref<1x8x1xf32, #tpu.memory_space<vmem>>, %arg6: memref<1x8x1xf32, #tpu.memory_space<vmem>>, %arg7: memref<1x8x1xf32, #tpu.memory_space<vmem>>, %arg8: memref<8x256xf32, #tpu.memory_space<vmem>>, %arg9: memref<8x256xf32, #tpu.memory_space<vmem>>, %arg10: memref<8x256xf32, #tpu.memory_space<vmem>>, %arg11: memref<8x256xf32, #tpu.memory_space<vmem>>) attributes {dimension_semantics = [#tpu.dimension_semantics<parallel>, #tpu.dimension_semantics<arbitrary>], iteration_bounds = array<i64: 1, 1>, scalar_prefetch = 0 : i64, scratch_operands = 4 : i64, tpu.core_type = #tpu.core_type<tc>, window_params = [{transform_indices = @transform_0, window_bounds = array<i64: 8, 256>}, {transform_indices = @transform_1, window_bounds = array<i64: 8, 256>}, {transform_indices = @transform_2, window_bounds = array<i64: 1, 8, 1>}, {transform_indices = @transform_3, window_bounds = array<i64: 1, 8, 1>}, {transform_indices = @transform_4, window_bounds = array<i64: 1, 8, 1>}, {transform_indices = @transform_5, window_bounds = array<i64: 1, 8, 1>}]} {
    %c0_i32 = arith.constant 0 : i32
    %0 = arith.cmpi eq, %arg1, %c0_i32 : i32
    %1 = arith.extui %0 : i1 to i32
    %c0_i32_0 = arith.constant 0 : i32
    %2 = arith.cmpi ne, %1, %c0_i32_0 : i32
    scf.if %2 {
      %cst_27 = arith.constant 0.000000e+00 : f32
      %52 = vector.broadcast %cst_27 : f32 to vector<8x256xf32>
      %c0_28 = arith.constant 0 : index
      %c0_29 = arith.constant 0 : index
      %53 = vector.load %arg8[%c0_28, %c0_29] : memref<8x256xf32, #tpu.memory_space<vmem>>, vector<8x256xf32>
      tpu.vector_store %arg8[%c0_28, %c0_29], %52 {strides = array<i32>} : memref<8x256xf32, #tpu.memory_space<vmem>>, vector<8x256xf32>,
      %cst_30 = arith.constant 0.000000e+00 : f32
      %54 = vector.broadcast %cst_30 : f32 to vector<8x256xf32>
      %c0_31 = arith.constant 0 : index
      %c0_32 = arith.constant 0 : index
      %55 = vector.load %arg9[%c0_31, %c0_32] : memref<8x256xf32, #tpu.memory_space<vmem>>, vector<8x256xf32>
      tpu.vector_store %arg9[%c0_31, %c0_32], %54 {strides = array<i32>} : memref<8x256xf32, #tpu.memory_space<vmem>>, vector<8x256xf32>,
      %cst_33 = arith.constant 0.000000e+00 : f32
      %56 = vector.broadcast %cst_33 : f32 to vector<8x256xf32>
      %c0_34 = arith.constant 0 : index
      %c0_35 = arith.constant 0 : index
      %57 = vector.load %arg10[%c0_34, %c0_35] : memref<8x256xf32, #tpu.memory_space<vmem>>, vector<8x256xf32>
      tpu.vector_store %arg10[%c0_34, %c0_35], %56 {strides = array<i32>} : memref<8x256xf32, #tpu.memory_space<vmem>>, vector<8x256xf32>,
      %cst_36 = arith.constant 0.000000e+00 : f32
      %58 = vector.broadcast %cst_36 : f32 to vector<8x256xf32>
      %c0_37 = arith.constant 0 : index
      %c0_38 = arith.constant 0 : index
      %59 = vector.load %arg11[%c0_37, %c0_38] : memref<8x256xf32, #tpu.memory_space<vmem>>, vector<8x256xf32>
      tpu.vector_store %arg11[%c0_37, %c0_38], %58 {strides = array<i32>} : memref<8x256xf32, #tpu.memory_space<vmem>>, vector<8x256xf32>,
    } else {
    }
    %cst = arith.constant 0.000000e+00 : f32
    %3 = vector.broadcast %cst : f32 to vector<8x256xf32>
    %c0_i32_1 = arith.constant 0 : i32
    %c256_i32 = arith.constant 256 : i32
    %4 = arith.muli %c0_i32_1, %c256_i32 : i32
    %5 = tpu.assume_multiple %4, 256 : i32
    %c0 = arith.constant 0 : index
    %6 = arith.index_cast %5 : i32 to index
    %7 = vector.load %arg2[%c0, %6] : memref<8x256xf32, #tpu.memory_space<vmem>>, vector<8x256xf32>
    %c0_2 = arith.constant 0 : index
    %8 = arith.index_cast %5 : i32 to index
    %9 = vector.load %arg3[%c0_2, %8] : memref<8x256xf32, #tpu.memory_space<vmem>>, vector<8x256xf32>
    %10 = math.absf %7 : vector<8x256xf32>
    %cst_3 = arith.constant 0.000000e+00 : f32
    %11 = vector.broadcast %cst_3 : f32 to vector<8x256xf32>
    %12 = arith.subf %11, %10 : vector<8x256xf32>
    %13 = math.exp %12 : vector<8x256xf32>
    %cst_4 = arith.constant 1.000000e+00 : f32
    %14 = vector.broadcast %cst_4 : f32 to vector<8x256xf32>
    %15 = arith.addf %14, %13 : vector<8x256xf32>
    %16 = tpu.reciprocal %15 {approx = true} : vector<8x256xf32> -> vector<8x256xf32>
    %17 = arith.mulf %15, %16 : vector<8x256xf32>
    %cst_5 = arith.constant 2.000000e+00 : f32
    %18 = vector.broadcast %cst_5 : f32 to vector<8x256xf32>
    %19 = arith.subf %18, %17 : vector<8x256xf32>
    %20 = arith.mulf %16, %19 : vector<8x256xf32>
    %cst_6 = arith.constant 0.000000e+00 : f32
    %21 = vector.broadcast %cst_6 : f32 to vector<8x256xf32>
    %22 = arith.cmpf oge, %7, %21 : vector<8x256xf32>
    %cst_7 = arith.constant 1.000000e+00 : f32
    %23 = vector.broadcast %cst_7 : f32 to vector<8x256xf32>
    %24 = arith.select %22, %23, %13 : vector<8x256xi1>, vector<8x256xf32>
    %25 = arith.mulf %24, %20 : vector<8x256xf32>
    %cst_8 = arith.constant 0.000000e+00 : f32
    %26 = vector.broadcast %cst_8 : f32 to vector<8x256xf32>
    %27 = arith.maximumf %7, %26 : vector<8x256xf32>
    %28 = arith.mulf %7, %9 : vector<8x256xf32>
    %29 = arith.subf %27, %28 : vector<8x256xf32>
    %30 = math.log1p %13 : vector<8x256xf32>
    %31 = arith.addf %29, %30 : vector<8x256xf32>
    %32 = arith.mulf %25, %9 : vector<8x256xf32>
    %33 = arith.addf %3, %32 : vector<8x256xf32>
    %34 = arith.addf %3, %25 : vector<8x256xf32>
    %35 = arith.addf %3, %9 : vector<8x256xf32>
    %36 = arith.addf %3, %31 : vector<8x256xf32>
    %c1_i32 = arith.constant 1 : i32
    %c0_9 = arith.constant 0 : index
    %c0_10 = arith.constant 0 : index
    %37 = vector.load %arg8[%c0_9, %c0_10] : memref<8x256xf32, #tpu.memory_space<vmem>>, vector<8x256xf32>
    %38 = arith.addf %37, %33 : vector<8x256xf32>
    %c0_11 = arith.constant 0 : index
    %c0_12 = arith.constant 0 : index
    %39 = vector.load %arg8[%c0_11, %c0_12] : memref<8x256xf32, #tpu.memory_space<vmem>>, vector<8x256xf32>
    tpu.vector_store %arg8[%c0_11, %c0_12], %38 {strides = array<i32>} : memref<8x256xf32, #tpu.memory_space<vmem>>, vector<8x256xf32>,
    %c0_13 = arith.constant 0 : index
    %c0_14 = arith.constant 0 : index
    %40 = vector.load %arg9[%c0_13, %c0_14] : memref<8x256xf32, #tpu.memory_space<vmem>>, vector<8x256xf32>
    %41 = arith.addf %40, %34 : vector<8x256xf32>
    %c0_15 = arith.constant 0 : index
    %c0_16 = arith.constant 0 : index
    %42 = vector.load %arg9[%c0_15, %c0_16] : memref<8x256xf32, #tpu.memory_space<vmem>>, vector<8x256xf32>
    tpu.vector_store %arg9[%c0_15, %c0_16], %41 {strides = array<i32>} : memref<8x256xf32, #tpu.memory_space<vmem>>, vector<8x256xf32>,
    %c0_17 = arith.constant 0 : index
    %c0_18 = arith.constant 0 : index
    %43 = vector.load %arg10[%c0_17, %c0_18] : memref<8x256xf32, #tpu.memory_space<vmem>>, vector<8x256xf32>
    %44 = arith.addf %43, %35 : vector<8x256xf32>
    %c0_19 = arith.constant 0 : index
    %c0_20 = arith.constant 0 : index
    %45 = vector.load %arg10[%c0_19, %c0_20] : memref<8x256xf32, #tpu.memory_space<vmem>>, vector<8x256xf32>
    tpu.vector_store %arg10[%c0_19, %c0_20], %44 {strides = array<i32>} : memref<8x256xf32, #tpu.memory_space<vmem>>, vector<8x256xf32>,
    %c0_21 = arith.constant 0 : index
    %c0_22 = arith.constant 0 : index
    %46 = vector.load %arg11[%c0_21, %c0_22] : memref<8x256xf32, #tpu.memory_space<vmem>>, vector<8x256xf32>
    %47 = arith.addf %46, %36 : vector<8x256xf32>
    %c0_23 = arith.constant 0 : index
    %c0_24 = arith.constant 0 : index
    %48 = vector.load %arg11[%c0_23, %c0_24] : memref<8x256xf32, #tpu.memory_space<vmem>>, vector<8x256xf32>
    tpu.vector_store %arg11[%c0_23, %c0_24], %47 {strides = array<i32>} : memref<8x256xf32, #tpu.memory_space<vmem>>, vector<8x256xf32>,
    %c0_i32_25 = arith.constant 0 : i32
    %49 = arith.cmpi eq, %arg1, %c0_i32_25 : i32
    %50 = arith.extui %49 : i1 to i32
    %c0_i32_26 = arith.constant 0 : i32
    %51 = arith.cmpi ne, %50, %c0_i32_26 : i32
    scf.if %51 {
      %c0_27 = arith.constant 0 : index
      %c0_28 = arith.constant 0 : index
      %52 = vector.load %arg8[%c0_27, %c0_28] : memref<8x256xf32, #tpu.memory_space<vmem>>, vector<8x256xf32>
      %cst_29 = arith.constant dense<0.000000e+00> : vector<8xf32>
      %53 = vector.multi_reduction <add>, %52, %cst_29 [1] : vector<8x256xf32> to vector<8xf32>
      %54 = vector.shape_cast %53 : vector<8xf32> to vector<8x1xf32>
      %c0_30 = arith.constant 0 : index
      %c0_31 = arith.constant 0 : index
      %c0_32 = arith.constant 0 : index
      %55 = vector.load %arg4[%c0_30, %c0_31, %c0_32] : memref<1x8x1xf32, #tpu.memory_space<vmem>>, vector<1x8x1xf32>
      %56 = vector.shape_cast %55 : vector<1x8x1xf32> to vector<8x1xf32>
      %57 = vector.shape_cast %54 : vector<8x1xf32> to vector<1x8x1xf32>
      tpu.vector_store %arg4[%c0_30, %c0_31, %c0_32], %57 {strides = array<i32>} : memref<1x8x1xf32, #tpu.memory_space<vmem>>, vector<1x8x1xf32>,
      %c0_33 = arith.constant 0 : index
      %c0_34 = arith.constant 0 : index
      %58 = vector.load %arg9[%c0_33, %c0_34] : memref<8x256xf32, #tpu.memory_space<vmem>>, vector<8x256xf32>
      %cst_35 = arith.constant dense<0.000000e+00> : vector<8xf32>
      %59 = vector.multi_reduction <add>, %58, %cst_35 [1] : vector<8x256xf32> to vector<8xf32>
      %60 = vector.shape_cast %59 : vector<8xf32> to vector<8x1xf32>
      %c0_36 = arith.constant 0 : index
      %c0_37 = arith.constant 0 : index
      %c0_38 = arith.constant 0 : index
      %61 = vector.load %arg5[%c0_36, %c0_37, %c0_38] : memref<1x8x1xf32, #tpu.memory_space<vmem>>, vector<1x8x1xf32>
      %62 = vector.shape_cast %61 : vector<1x8x1xf32> to vector<8x1xf32>
      %63 = vector.shape_cast %60 : vector<8x1xf32> to vector<1x8x1xf32>
      tpu.vector_store %arg5[%c0_36, %c0_37, %c0_38], %63 {strides = array<i32>} : memref<1x8x1xf32, #tpu.memory_space<vmem>>, vector<1x8x1xf32>,
      %c0_39 = arith.constant 0 : index
      %c0_40 = arith.constant 0 : index
      %64 = vector.load %arg10[%c0_39, %c0_40] : memref<8x256xf32, #tpu.memory_space<vmem>>, vector<8x256xf32>
      %cst_41 = arith.constant dense<0.000000e+00> : vector<8xf32>
      %65 = vector.multi_reduction <add>, %64, %cst_41 [1] : vector<8x256xf32> to vector<8xf32>
      %66 = vector.shape_cast %65 : vector<8xf32> to vector<8x1xf32>
      %c0_42 = arith.constant 0 : index
      %c0_43 = arith.constant 0 : index
      %c0_44 = arith.constant 0 : index
      %67 = vector.load %arg6[%c0_42, %c0_43, %c0_44] : memref<1x8x1xf32, #tpu.memory_space<vmem>>, vector<1x8x1xf32>
      %68 = vector.shape_cast %67 : vector<1x8x1xf32> to vector<8x1xf32>
      %69 = vector.shape_cast %66 : vector<8x1xf32> to vector<1x8x1xf32>
      tpu.vector_store %arg6[%c0_42, %c0_43, %c0_44], %69 {strides = array<i32>} : memref<1x8x1xf32, #tpu.memory_space<vmem>>, vector<1x8x1xf32>,
      %c0_45 = arith.constant 0 : index
      %c0_46 = arith.constant 0 : index
      %70 = vector.load %arg11[%c0_45, %c0_46] : memref<8x256xf32, #tpu.memory_space<vmem>>, vector<8x256xf32>
      %cst_47 = arith.constant dense<0.000000e+00> : vector<8xf32>
      %71 = vector.multi_reduction <add>, %70, %cst_47 [1] : vector<8x256xf32> to vector<8xf32>
      %72 = vector.shape_cast %71 : vector<8xf32> to vector<8x1xf32>
      %c0_48 = arith.constant 0 : index
      %c0_49 = arith.constant 0 : index
      %c0_50 = arith.constant 0 : index
      %73 = vector.load %arg7[%c0_48, %c0_49, %c0_50] : memref<1x8x1xf32, #tpu.memory_space<vmem>>, vector<1x8x1xf32>
      %74 = vector.shape_cast %73 : vector<1x8x1xf32> to vector<8x1xf32>
      %75 = vector.shape_cast %72 : vector<8x1xf32> to vector<1x8x1xf32>
      tpu.vector_store %arg7[%c0_48, %c0_49, %c0_50], %75 {strides = array<i32>} : memref<1x8x1xf32, #tpu.memory_space<vmem>>, vector<1x8x1xf32>,
    } else {
    }
    return
  }
  func.func @transform_0(%arg0: i32, %arg1: i32) -> (i32, i32) {
    %c1_i32 = arith.constant 1 : i32
    %0 = arith.muli %arg0, %c1_i32 : i32
    %1 = arith.addi %0, %arg1 : i32
    %c0_i32 = arith.constant 0 : i32
    %2 = arith.minsi %1, %c0_i32 : i32
    %c0_i32_0 = arith.constant 0 : i32
    %c0_i32_1 = arith.constant 0 : i32
    return %c0_i32_0, %2 : i32, i32
  }
  func.func @transform_1(%arg0: i32, %arg1: i32) -> (i32, i32) {
    %c1_i32 = arith.constant 1 : i32
    %0 = arith.muli %arg0, %c1_i32 : i32
    %1 = arith.addi %0, %arg1 : i32
    %c0_i32 = arith.constant 0 : i32
    %2 = arith.minsi %1, %c0_i32 : i32
    %c0_i32_0 = arith.constant 0 : i32
    %c0_i32_1 = arith.constant 0 : i32
    return %c0_i32_0, %2 : i32, i32
  }
  func.func @transform_2(%arg0: i32, %arg1: i32) -> (i32, i32, i32) {
    %c0_i32 = arith.constant 0 : i32
    %c0_i32_0 = arith.constant 0 : i32
    %c0_i32_1 = arith.constant 0 : i32
    return %arg0, %c0_i32, %c0_i32_0 : i32, i32, i32
  }
  func.func @transform_3(%arg0: i32, %arg1: i32) -> (i32, i32, i32) {
    %c0_i32 = arith.constant 0 : i32
    %c0_i32_0 = arith.constant 0 : i32
    %c0_i32_1 = arith.constant 0 : i32
    return %arg0, %c0_i32, %c0_i32_0 : i32, i32, i32
  }
  func.func @transform_4(%arg0: i32, %arg1: i32) -> (i32, i32, i32) {
    %c0_i32 = arith.constant 0 : i32
    %c0_i32_0 = arith.constant 0 : i32
    %c0_i32_1 = arith.constant 0 : i32
    return %arg0, %c0_i32, %c0_i32_0 : i32, i32, i32
  }
  func.func @transform_5(%arg0: i32, %arg1: i32) -> (i32, i32, i32) {
    %c0_i32 = arith.constant 0 : i32
    %c0_i32_0 = arith.constant 0 : i32
    %c0_i32_1 = arith.constant 0 : i32
    return %arg0, %c0_i32, %c0_i32_0 : i32, i32, i32
  }
}

</mosaic_0001>

<bundles_post_ra>
// kernel: tpu_custom_call.1
= control target key start
LH: loop header
LB: loop body
LE: loop exit
PB: predicated region body
PF: predicated region fallthrough
CT: control target
= control target key end

     0   :  { %11 = vsyncpa [#allocation7], 0  ;;  %s330_s0 = inlined_call_operand.hbm [shape: f32[8,256], index: 0, kind: input, shape index: {}]   ;;  %s331_s1 = inlined_call_operand.hbm [shape: f32[8,256], index: 1, kind: input, shape index: {}]   ;;  %s332_s2 = inlined_call_operand.vmem [shape: f32[1,8,1], index: 2, kind: output, shape index: {0}]   ;;  %s333_s3 = inlined_call_operand.vmem [shape: f32[1,8,1], index: 3, kind: output, shape index: {1}]   ;;  %s334_s4 = inlined_call_operand.vmem [shape: f32[1,8,1], index: 4, kind: output, shape index: {2}]   ;;  %s335_s5 = inlined_call_operand.vmem [shape: f32[1,8,1], index: 5, kind: output, shape index: {3}]  }
   0x1   :  { %s24_s20 = sshll.u32 %s330_s0, 4  ;;  %s25_s20 = int_to_ptr.hbm [resolvable:$true] %s24_s20 }
   0x2   :  { %12 = vsyncpa [#allocation9], 0  ;;  %s279_s21 = smov [#allocation6]   ;;  %s41_s25 = sshll.u32 %s331_s1, 4  ;;  %s42_s25 = int_to_ptr.hbm [resolvable:$true] %s41_s25 }
   0x3   :  { %s26_s22 = sshll.u32 %s279_s21, 4  ;;  %s280_s26 = smov [#allocation8]   ;;  %s27_s22 = int_to_ptr.vmem [resolvable:$true] %s26_s22 }
   0x4   :  { %29 = dma.hbm_to_vmem [thread:$0]  %s25_s20, 256, %s27_s22, [#allocation7]  }
   0x5   :  { %s43_s27 = sshll.u32 %s280_s26, 4  ;;  %s44_s27 = int_to_ptr.vmem [resolvable:$true] %s43_s27 }
   0x6   :  { %46 = dma.hbm_to_vmem [thread:$0]  %s42_s25, 256, %s44_s27, [#allocation9]  }
   0x7   :  { %275 = dma.done.wait [#allocation7], 256  }
   0x8   :  { %276 = vsyncadd [#allocation7], 4294967040 }
   0x9   :  { %277 = dma.done.wait [#allocation9], 256  }
   0xa   :  { %278 = vsyncadd [#allocation9], 4294967040  ;;  %v77_v0 = vld [vmem:[#allocation8] sm:$0xff]  ;;  %v78_v1 = vld [vmem:[#allocation8 + $0x8] sm:$0xff]  ;;  %vm171_vm4 = vcmask 7168  }
   0xb   :  { %v75_v2 = vld [vmem:[#allocation6] sm:$0xff]  ;;  %v181_v3 = vadd.f32 %v78_v1, %v77_v0  ;;  %v76_v4 = vld [vmem:[#allocation6 + $0x8] sm:$0xff] }
   0xc   :  { %v79_v5 = vand.u32 2147483647, %v75_v2  ;;  %v80_v6 = vand.u32 2147483647, %v76_v4  ;;  %v105_v18 = vmul.f32 %v77_v0, %v75_v2  ;;  %v103_v19 = vmax.f32 %v75_v2, 0.0 }
   0xd   :  { %182 = vadd.xlane.f32.xlu1 %v181_v3  ;;  %v106_v22 = vmul.f32 %v78_v1, %v76_v4  ;;  %v104_v23 = vmax.f32 %v76_v4, 0.0  ;;  %vm97_vm0 = vcmp.ge.f32.partialorder %v75_v2, 0.0  ;;  %vm98_vm1 = vcmp.ge.f32.partialorder %v76_v4, 0.0 }
   0xe   :  { %v81_v7 = vsub.f32 0.0, %v79_v5  ;;  %v82_v8 = vsub.f32 0.0, %v80_v6  ;;  %v107_v31 = vsub.f32 %v103_v19, %v105_v18 }
   0xf   :  { %v108_v35 = vsub.f32 %v104_v23, %v106_v22 }
  0x10   :  { %v83_v9 = vmul.f32 1.442695, %v81_v7  ;;  %v85_v10 = vmul.f32 1.442695, %v82_v8 }
  0x12   :  { %215 = vpow2.f32 %v83_v9 }
  0x13   :  { %217 = vpow2.f32 %v85_v10 }
  0x18   :  { %v216_v11 = vpop.eup %215 }
  0x19   :  { %v218_v12 = vpop.eup %217  ;;  %v87_v13 = vadd.f32 1.0, %v216_v11  ;;  %v112_v15 = vmul.f32 -0.5, %v216_v11  ;;  %v115_v20 = vand.u32 2147483647, %v216_v11  ;;  %v99_v38 = vsel %vm97_vm0, 1.0, %v216_v11 }
  0x1a   :  { %v88_v14 = vadd.f32 1.0, %v218_v12  ;;  %v121_v16 = vmul.f32 -0.5, %v218_v12  ;;  %v124_v24 = vand.u32 2147483647, %v218_v12  ;;  %v100_v41 = vsel %vm98_vm1, 1.0, %v218_v12 }
  0x1b   :  { %219 = vrcp.f32 %v87_v13  ;;  %v113_v17 = vadd.f32 1.0, %v112_v15  ;;  %vm116_vm2 = vcmp.lt.f32.partialorder %v115_v20, 0.0004427343 }
  0x1c   :  { %221 = vrcp.f32 %v88_v14  ;;  %v122_v21 = vadd.f32 1.0, %v121_v16  ;;  %vm125_vm3 = vcmp.lt.f32.partialorder %v124_v24, 0.0004427343 }
  0x1d   :  { %223 = vlog2.f32 %v87_v13  ;;  %v114_v28 = vmul.f32 %v216_v11, %v113_v17 }
  0x1e   :  { %225 = vlog2.f32 %v88_v14  ;;  %v123_v32 = vmul.f32 %v218_v12, %v122_v21 }
  0x21   :  { %v220_v25 = vpop.eup %219 }
  0x22   :  { %v222_v26 = vpop.eup %221  ;;  %v91_v27 = vmul.f32 %v220_v25, %v87_v13 }
  0x23   :  { %v224_v29 = vpop.eup %223  ;;  %v92_v30 = vmul.f32 %v222_v26, %v88_v14 }
  0x24   :  { %v226_v33 = vpop.eup %225  ;;  %v93_v34 = vsub.f32 2.0, %v91_v27  ;;  %v111_v36 = vmul.f32 0.6931472, %v224_v29 }
  0x25   :  { %v94_v37 = vsub.f32 2.0, %v92_v30  ;;  %v120_v39 = vmul.f32 0.6931472, %v226_v33 }
  0x26   :  { %v95_v40 = vmul.f32 %v220_v25, %v93_v34  ;;  %v117_v42 = vsel %vm116_vm2, %v114_v28, %v111_v36 }
  0x27   :  { %v96_v43 = vmul.f32 %v222_v26, %v94_v37  ;;  %v126_v44 = vsel %vm125_vm3, %v123_v32, %v120_v39  ;;  %v127_v45 = vadd.f32 %v117_v42, %v107_v31 }
  0x28   :  { %v101_v46 = vmul.f32 %v99_v38, %v95_v40  ;;  %v128_v47 = vadd.f32 %v126_v44, %v108_v35 }
  0x29   :  { %v102_v48 = vmul.f32 %v100_v41, %v96_v43 }
  0x2a   :  { %v129_v49 = vmul.f32 %v101_v46, %v77_v0  ;;  %v187_v50 = vadd.f32 %v128_v47, %v127_v45 }
  0x2b   :  { %v130_v51 = vmul.f32 %v102_v48, %v78_v1  ;;  %v175_v53 = vadd.f32 %v102_v48, %v101_v46 }
  0x2c   :  { %188 = vadd.xlane.f32.xlu1 %v187_v50 }
  0x2d   :  { %v168_v52 = vadd.f32 %v130_v51, %v129_v49 }
  0x2f   :  { %169 = vadd.xlane.f32.xlu0 %v168_v52 }
  0x37   :  { %176 = vadd.xlane.f32.xlu0 %v175_v53 }
  0x80   :  { %v183_v54 = vpop.xlane.xlu1 %182 }
  0x81   :  { %184 = vst.msk [vmem:[%s334_s4] sm:$0xff] %vm171_vm4, %v183_v54 }
  0x9f   :  { %v189_v55 = vpop.xlane.xlu1 %188 }
  0xa0   :  { %190 = vst.msk [vmem:[%s335_s5] sm:$0xff] %vm171_vm4, %v189_v55 }
  0xa2   :  { %v170_v56 = vpop.xlane.xlu0 %169 }
  0xa3   :  { %172 = vst.msk [vmem:[%s332_s2] sm:$0xff] %vm171_vm4, %v170_v56 }
  0xaa   :  { %v177_v57 = vpop.xlane.xlu0 %176 }
  0xab   :  { %178 = vst.msk [vmem:[%s333_s3] sm:$0xff] %vm171_vm4, %v177_v57 }
  0xac   :  { %207 = vsyncpa [#allocation7], 1 }
  0xad   :  { %208 = vsyncpa [#allocation9], 1 }

</bundles_post_ra>
